<compile_context>
chip_gen: v7x
topology: tpu7x:2x2x1
jax: 0.10.0
libtpu: 0.0.40
codegen_flags: <defaults>
</compile_context>

<pallas_src>
import functools

import jax
import jax.numpy as jnp
from jax.experimental import pallas as pl
from jax.experimental.pallas import tpu as pltpu

LN_EPS = 1e-5  # PyTorch nn.LayerNorm default
LANES = 128
OUT_LANES = 128


def _round_up(x, m):
    return ((x + m - 1) // m) * m


def _masked_layernorm(x, gamma, beta, n_real):
    """LayerNorm over the first `n_real` lanes of a lane-padded tile.

    Assumes padded columns of `x` are exactly zero and gamma/beta are
    zero-padded, so padded output columns come out as zero.
    """
    inv_n = 1.0 / float(n_real)
    mu = jnp.sum(x, axis=-1, keepdims=True) * inv_n
    lane = jax.lax.broadcasted_iota(jnp.int32, x.shape, dimension=1)
    mask = (lane < n_real).astype(x.dtype)
    diff = (x - mu) * mask
    var = jnp.sum(diff * diff, axis=-1, keepdims=True) * inv_n
    return diff * jax.lax.rsqrt(var + LN_EPS) * gamma + beta


def critic_kernel(state_ref, action_ref,
                  w1_ref, w2_ref, wa_ref,
                  pack1_ref,        # (3, FC1P): [b1, gamma1, beta1]
                  pack2_ref,        # (5, FC2P): [b2, gamma2, beta2, ba, wq]
                  bq_ref,           # (1,) scalar in SMEM
                  out_ref,
                  *, fc1_real, fc2_real):
    # --- state branch ---
    x = state_ref[...]
    h1 = jnp.dot(x, w1_ref[...], preferred_element_type=jnp.float32)
    h1 = h1 + pack1_ref[0:1, :]
    h1 = _masked_layernorm(h1, pack1_ref[1:2, :], pack1_ref[2:3, :], fc1_real)
    h1 = jnp.maximum(h1, 0.0)                                  # relu

    h2 = jnp.dot(h1, w2_ref[...], preferred_element_type=jnp.float32)
    h2 = h2 + pack2_ref[0:1, :]
    h2 = _masked_layernorm(h2, pack2_ref[1:2, :], pack2_ref[2:3, :], fc2_real)

    # --- action branch ---
    a = action_ref[...]
    av = jnp.dot(a, wa_ref[...], preferred_element_type=jnp.float32)
    av = jnp.maximum(av + pack2_ref[3:4, :], 0.0)              # relu(action_value)

    # --- fuse ---
    sav = jnp.maximum(h2 + av, 0.0)                            # relu(add)

    # fc2 -> 1 projection: VPU multiply + lane reduce (no N=1 MXU matmul).
    q = jnp.sum(sav * pack2_ref[4:5, :], axis=-1, keepdims=True) + bq_ref[0]

    # Lane-dense store; column 0 is the real output, sliced in the wrapper.
    out_ref[...] = jnp.broadcast_to(q, out_ref.shape).astype(out_ref.dtype)


@jax.jit
def critic_forward(state, action, params):
    B, in_dims = state.shape
    n_actions = action.shape[1]
    fc1 = params["w1"].shape[0]
    fc2 = params["w2"].shape[0]

    INP = _round_up(in_dims, LANES)
    ACT = _round_up(n_actions, LANES)
    F1 = _round_up(fc1, LANES)
    F2 = _round_up(fc2, LANES)

    TILE_B = min(_round_up(B, 8), 128)
    Bp = _round_up(B, TILE_B)

    f32 = jnp.float32

    def pad2(x, rows, cols):
        return jnp.pad(x.astype(f32),
                       ((0, rows - x.shape[0]), (0, cols - x.shape[1])))

    def pad_row(v, cols):
        v = v.astype(f32).reshape(1, -1)
        return jnp.pad(v, ((0, 0), (0, cols - v.shape[1])))

    # Activations: zero-pad batch and feature dims.
    state_p = pad2(state, Bp, INP)
    action_p = pad2(action, Bp, ACT)

    # Weights: pre-transpose to (in, out) and zero-pad both dims.
    w1 = pad2(params["w1"].T, INP, F1)
    w2 = pad2(params["w2"].T, F1, F2)
    wa = pad2(params["wa"].T, ACT, F2)

    # Pack small per-layer vectors (fewer DMA descriptors / VMEM buffers).
    pack1 = jnp.concatenate([pad_row(params["b1"], F1),
                             pad_row(params["g1"], F1),
                             pad_row(params["be1"], F1)], axis=0)   # (3, F1)
    pack2 = jnp.concatenate([pad_row(params["b2"], F2),
                             pad_row(params["g2"], F2),
                             pad_row(params["be2"], F2),
                             pad_row(params["ba"], F2),
                             pad_row(params["wq"], F2)], axis=0)    # (5, F2)
    bq = params["bq"].astype(f32).reshape((1,))                     # SMEM scalar

    kernel = functools.partial(critic_kernel, fc1_real=fc1, fc2_real=fc2)

    out = pl.pallas_call(
        kernel,
        out_shape=jax.ShapeDtypeStruct((Bp, OUT_LANES), jnp.float32),
        grid=(Bp // TILE_B,),
        in_specs=[
            pl.BlockSpec((TILE_B, INP), lambda i: (i, 0)),   # state tile
            pl.BlockSpec((TILE_B, ACT), lambda i: (i, 0)),   # action tile
            pl.BlockSpec((INP, F1), lambda i: (0, 0)),       # w1 (resident)
            pl.BlockSpec((F1, F2), lambda i: (0, 0)),        # w2 (resident)
            pl.BlockSpec((ACT, F2), lambda i: (0, 0)),       # wa (resident)
            pl.BlockSpec((3, F1), lambda i: (0, 0)),         # pack1
            pl.BlockSpec((5, F2), lambda i: (0, 0)),         # pack2
            pl.BlockSpec(memory_space=pltpu.MemorySpace.SMEM),  # bq scalar
        ],
        out_specs=pl.BlockSpec((TILE_B, OUT_LANES), lambda i: (i, 0)),
        compiler_params=pltpu.CompilerParams(
            dimension_semantics=("parallel",)),
    )(state_p, action_p, w1, w2, wa, pack1, pack2, bq)

    return out[:B, 0:1]


def init_params(key, input_dims, n_actions, fc1_dims, fc2_dims):
    """Deterministic init mirroring CriticNetwork.__init__ (fan-in uniform).

    Weights are kept PyTorch-style (out_features, in_features); the wrapper
    transposes / pads them once per call.
    """
    ks = jax.random.split(key, 8)
    f1 = 1.0 / jnp.sqrt(input_dims)
    f2 = 1.0 / jnp.sqrt(fc1_dims)
    fa = 1.0 / jnp.sqrt(n_actions)   # PyTorch default Linear init bound
    f3 = 0.0003
    u = lambda k, shape, b: jax.random.uniform(k, shape, jnp.float32, -b, b)
    return {
        "w1": u(ks[0], (fc1_dims, input_dims), f1),
        "b1": u(ks[1], (1, fc1_dims), f1),
        "g1": jnp.ones((1, fc1_dims), jnp.float32),    # LayerNorm weight
        "be1": jnp.zeros((1, fc1_dims), jnp.float32),  # LayerNorm bias
        "w2": u(ks[2], (fc2_dims, fc1_dims), f2),
        "b2": u(ks[3], (1, fc2_dims), f2),
        "g2": jnp.ones((1, fc2_dims), jnp.float32),
        "be2": jnp.zeros((1, fc2_dims), jnp.float32),
        "wa": u(ks[4], (fc2_dims, n_actions), fa),
        "ba": u(ks[5], (1, fc2_dims), fa),
        "wq": u(ks[6], (1, fc2_dims), f3),
        "bq": u(ks[7], (1, 1), f3),
    }


def _layernorm_ref(x, gamma, beta):
    mu = jnp.mean(x, axis=-1, keepdims=True)
    var = jnp.mean((x - mu) * (x - mu), axis=-1, keepdims=True)
    return (x - mu) * jax.lax.rsqrt(var + LN_EPS) * gamma + beta


def reference_forward(state, action, p):
    """Pure-JAX reference matching the PyTorch forward pass."""
    h1 = state @ p["w1"].T + p["b1"]
    h1 = _layernorm_ref(h1, p["g1"], p["be1"])
    h1 = jnp.maximum(h1, 0.0)
    h2 = h1 @ p["w2"].T + p["b2"]
    h2 = _layernorm_ref(h2, p["g2"], p["be2"])
    av = jnp.maximum(action @ p["wa"].T + p["ba"], 0.0)
    sav = jnp.maximum(h2 + av, 0.0)
    return sav @ p["wq"].T + p["bq"]


if __name__ == "__main__":
    key = jax.random.PRNGKey(0)
    k_p, k_s, k_a = jax.random.split(key, 3)

    B, INPUT_DIMS, N_ACTIONS, FC1, FC2 = 8, 16, 4, 32, 32

    params = init_params(k_p, INPUT_DIMS, N_ACTIONS, FC1, FC2)
    state = jax.random.normal(k_s, (B, INPUT_DIMS), jnp.float32)
    action = jax.random.normal(k_a, (B, N_ACTIONS), jnp.float32)

    q = critic_forward(state, action, params)
    q = jax.block_until_ready(q)

    q_ref = reference_forward(state, action, params)
    assert q.shape == (B, 1)
    assert jnp.allclose(q, q_ref, atol=1e-5, rtol=1e-5), "mismatch vs reference"

    print("KERNEL_OK")
</pallas_src>

<mosaic_0001>
module attributes {stable_mosaic.version = 11 : i64} {
  func.func @critic_kernel(%arg0: i32, %arg1: memref<8x128xf32, #tpu.memory_space<vmem>>, %arg2: memref<8x128xf32, #tpu.memory_space<vmem>>, %arg3: memref<128x128xf32, #tpu.memory_space<vmem>>, %arg4: memref<128x128xf32, #tpu.memory_space<vmem>>, %arg5: memref<128x128xf32, #tpu.memory_space<vmem>>, %arg6: memref<3x128xf32, #tpu.memory_space<vmem>>, %arg7: memref<5x128xf32, #tpu.memory_space<vmem>>, %arg8: memref<1xf32, #tpu.memory_space<smem>>, %arg9: memref<8x128xf32, #tpu.memory_space<vmem>>) attributes {dimension_semantics = [#tpu.dimension_semantics<parallel>], iteration_bounds = array<i64: 1>, scalar_prefetch = 0 : i64, scratch_operands = 0 : i64, tpu.core_type = #tpu.core_type<tc>, window_params = [{transform_indices = @transform_0, window_bounds = array<i64: 8, 128>}, {transform_indices = @transform_1, window_bounds = array<i64: 8, 128>}, {pipeline_mode = #tpu.pipeline_mode<synchronous>, transform_indices = @transform_2, window_bounds = array<i64: 128, 128>}, {pipeline_mode = #tpu.pipeline_mode<synchronous>, transform_indices = @transform_3, window_bounds = array<i64: 128, 128>}, {pipeline_mode = #tpu.pipeline_mode<synchronous>, transform_indices = @transform_4, window_bounds = array<i64: 128, 128>}, {pipeline_mode = #tpu.pipeline_mode<synchronous>, transform_indices = @transform_5, window_bounds = array<i64: 3, 128>}, {pipeline_mode = #tpu.pipeline_mode<synchronous>, transform_indices = @transform_6, window_bounds = array<i64: 5, 128>}, {transform_indices = @transform_7, window_bounds = array<i64: 1>}, {transform_indices = @transform_8, window_bounds = array<i64: 8, 128>}]} {
    %c0 = arith.constant 0 : index
    %c0_0 = arith.constant 0 : index
    %0 = vector.load %arg1[%c0, %c0_0] : memref<8x128xf32, #tpu.memory_space<vmem>>, vector<8x128xf32>
    %c0_1 = arith.constant 0 : index
    %c0_2 = arith.constant 0 : index
    %1 = vector.load %arg3[%c0_1, %c0_2] : memref<128x128xf32, #tpu.memory_space<vmem>>, vector<128x128xf32>
    %cst = arith.constant dense<0.000000e+00> : vector<8x128xf32>
    %2 = tpu.matmul %0, %1, %cst {dimension_numbers = #tpu.dot_dimension_numbers<[1], [0], [0], [1], [0, 0, 1, 1], [], []>} : vector<8x128xf32>, vector<128x128xf32>, vector<8x128xf32> -> vector<8x128xf32>
    %c0_3 = arith.constant 0 : index
    %c0_4 = arith.constant 0 : index
    %3 = vector.load %arg6[%c0_3, %c0_4] : memref<3x128xf32, #tpu.memory_space<vmem>>, vector<1x128xf32>
    %4 = vector.broadcast %3 : vector<1x128xf32> to vector<8x128xf32>
    %5 = arith.addf %2, %4 : vector<8x128xf32>
    %c1 = arith.constant 1 : index
    %c0_5 = arith.constant 0 : index
    %6 = vector.load %arg6[%c1, %c0_5] : memref<3x128xf32, #tpu.memory_space<vmem>>, vector<1x128xf32>
    %c2 = arith.constant 2 : index
    %c0_6 = arith.constant 0 : index
    %7 = vector.load %arg6[%c2, %c0_6] : memref<3x128xf32, #tpu.memory_space<vmem>>, vector<1x128xf32>
    %cst_7 = arith.constant dense<0.000000e+00> : vector<8xf32>
    %8 = vector.multi_reduction <add>, %5, %cst_7 [1] : vector<8x128xf32> to vector<8xf32>
    %9 = vector.shape_cast %8 : vector<8xf32> to vector<8x1xf32>
    %cst_8 = arith.constant 3.125000e-02 : f32
    %10 = vector.broadcast %cst_8 : f32 to vector<8x1xf32>
    %11 = arith.mulf %9, %10 : vector<8x1xf32>
    %12 = tpu.iota {dimensions = array<i32: 1>} : vector<8x128xi32>
    %c32_i32 = arith.constant 32 : i32
    %13 = vector.broadcast %c32_i32 : i32 to vector<8x128xi32>
    %14 = arith.cmpi slt, %12, %13 : vector<8x128xi32>
    %15 = arith.extui %14 : vector<8x128xi1> to vector<8x128xi32>
    %16 = arith.sitofp %15 : vector<8x128xi32> to vector<8x128xf32>
    %17 = vector.broadcast %11 : vector<8x1xf32> to vector<8x128xf32>
    %18 = arith.subf %5, %17 : vector<8x128xf32>
    %19 = arith.mulf %18, %16 : vector<8x128xf32>
    %20 = arith.mulf %19, %19 : vector<8x128xf32>
    %cst_9 = arith.constant dense<0.000000e+00> : vector<8xf32>
    %21 = vector.multi_reduction <add>, %20, %cst_9 [1] : vector<8x128xf32> to vector<8xf32>
    %22 = vector.shape_cast %21 : vector<8xf32> to vector<8x1xf32>
    %cst_10 = arith.constant 3.125000e-02 : f32
    %23 = vector.broadcast %cst_10 : f32 to vector<8x1xf32>
    %24 = arith.mulf %22, %23 : vector<8x1xf32>
    %cst_11 = arith.constant 9.99999974E-6 : f32
    %25 = vector.broadcast %cst_11 : f32 to vector<8x1xf32>
    %26 = arith.addf %24, %25 : vector<8x1xf32>
    %27 = math.rsqrt %26 : vector<8x1xf32>
    %28 = vector.broadcast %27 : vector<8x1xf32> to vector<8x128xf32>
    %29 = arith.mulf %19, %28 : vector<8x128xf32>
    %30 = vector.broadcast %6 : vector<1x128xf32> to vector<8x128xf32>
    %31 = arith.mulf %29, %30 : vector<8x128xf32>
    %32 = vector.broadcast %7 : vector<1x128xf32> to vector<8x128xf32>
    %33 = arith.addf %31, %32 : vector<8x128xf32>
    %cst_12 = arith.constant 0.000000e+00 : f32
    %34 = vector.broadcast %cst_12 : f32 to vector<8x128xf32>
    %35 = arith.maximumf %33, %34 : vector<8x128xf32>
    %c0_13 = arith.constant 0 : index
    %c0_14 = arith.constant 0 : index
    %36 = vector.load %arg4[%c0_13, %c0_14] : memref<128x128xf32, #tpu.memory_space<vmem>>, vector<128x128xf32>
    %cst_15 = arith.constant dense<0.000000e+00> : vector<8x128xf32>
    %37 = tpu.matmul %35, %36, %cst_15 {dimension_numbers = #tpu.dot_dimension_numbers<[1], [0], [0], [1], [0, 0, 1, 1], [], []>} : vector<8x128xf32>, vector<128x128xf32>, vector<8x128xf32> -> vector<8x128xf32>
    %c0_16 = arith.constant 0 : index
    %c0_17 = arith.constant 0 : index
    %38 = vector.load %arg7[%c0_16, %c0_17] : memref<5x128xf32, #tpu.memory_space<vmem>>, vector<1x128xf32>
    %39 = vector.broadcast %38 : vector<1x128xf32> to vector<8x128xf32>
    %40 = arith.addf %37, %39 : vector<8x128xf32>
    %c1_18 = arith.constant 1 : index
    %c0_19 = arith.constant 0 : index
    %41 = vector.load %arg7[%c1_18, %c0_19] : memref<5x128xf32, #tpu.memory_space<vmem>>, vector<1x128xf32>
    %c2_20 = arith.constant 2 : index
    %c0_21 = arith.constant 0 : index
    %42 = vector.load %arg7[%c2_20, %c0_21] : memref<5x128xf32, #tpu.memory_space<vmem>>, vector<1x128xf32>
    %cst_22 = arith.constant dense<0.000000e+00> : vector<8xf32>
    %43 = vector.multi_reduction <add>, %40, %cst_22 [1] : vector<8x128xf32> to vector<8xf32>
    %44 = vector.shape_cast %43 : vector<8xf32> to vector<8x1xf32>
    %cst_23 = arith.constant 3.125000e-02 : f32
    %45 = vector.broadcast %cst_23 : f32 to vector<8x1xf32>
    %46 = arith.mulf %44, %45 : vector<8x1xf32>
    %47 = tpu.iota {dimensions = array<i32: 1>} : vector<8x128xi32>
    %c32_i32_24 = arith.constant 32 : i32
    %48 = vector.broadcast %c32_i32_24 : i32 to vector<8x128xi32>
    %49 = arith.cmpi slt, %47, %48 : vector<8x128xi32>
    %50 = arith.extui %49 : vector<8x128xi1> to vector<8x128xi32>
    %51 = arith.sitofp %50 : vector<8x128xi32> to vector<8x128xf32>
    %52 = vector.broadcast %46 : vector<8x1xf32> to vector<8x128xf32>
    %53 = arith.subf %40, %52 : vector<8x128xf32>
    %54 = arith.mulf %53, %51 : vector<8x128xf32>
    %55 = arith.mulf %54, %54 : vector<8x128xf32>
    %cst_25 = arith.constant dense<0.000000e+00> : vector<8xf32>
    %56 = vector.multi_reduction <add>, %55, %cst_25 [1] : vector<8x128xf32> to vector<8xf32>
    %57 = vector.shape_cast %56 : vector<8xf32> to vector<8x1xf32>
    %cst_26 = arith.constant 3.125000e-02 : f32
    %58 = vector.broadcast %cst_26 : f32 to vector<8x1xf32>
    %59 = arith.mulf %57, %58 : vector<8x1xf32>
    %cst_27 = arith.constant 9.99999974E-6 : f32
    %60 = vector.broadcast %cst_27 : f32 to vector<8x1xf32>
    %61 = arith.addf %59, %60 : vector<8x1xf32>
    %62 = math.rsqrt %61 : vector<8x1xf32>
    %63 = vector.broadcast %62 : vector<8x1xf32> to vector<8x128xf32>
    %64 = arith.mulf %54, %63 : vector<8x128xf32>
    %65 = vector.broadcast %41 : vector<1x128xf32> to vector<8x128xf32>
    %66 = arith.mulf %64, %65 : vector<8x128xf32>
    %67 = vector.broadcast %42 : vector<1x128xf32> to vector<8x128xf32>
    %68 = arith.addf %66, %67 : vector<8x128xf32>
    %c0_28 = arith.constant 0 : index
    %c0_29 = arith.constant 0 : index
    %69 = vector.load %arg2[%c0_28, %c0_29] : memref<8x128xf32, #tpu.memory_space<vmem>>, vector<8x128xf32>
    %c0_30 = arith.constant 0 : index
    %c0_31 = arith.constant 0 : index
    %70 = vector.load %arg5[%c0_30, %c0_31] : memref<128x128xf32, #tpu.memory_space<vmem>>, vector<128x128xf32>
    %cst_32 = arith.constant dense<0.000000e+00> : vector<8x128xf32>
    %71 = tpu.matmul %69, %70, %cst_32 {dimension_numbers = #tpu.dot_dimension_numbers<[1], [0], [0], [1], [0, 0, 1, 1], [], []>} : vector<8x128xf32>, vector<128x128xf32>, vector<8x128xf32> -> vector<8x128xf32>
    %c3 = arith.constant 3 : index
    %c0_33 = arith.constant 0 : index
    %72 = vector.load %arg7[%c3, %c0_33] : memref<5x128xf32, #tpu.memory_space<vmem>>, vector<1x128xf32>
    %73 = vector.broadcast %72 : vector<1x128xf32> to vector<8x128xf32>
    %74 = arith.addf %71, %73 : vector<8x128xf32>
    %cst_34 = arith.constant 0.000000e+00 : f32
    %75 = vector.broadcast %cst_34 : f32 to vector<8x128xf32>
    %76 = arith.maximumf %74, %75 : vector<8x128xf32>
    %77 = arith.addf %68, %76 : vector<8x128xf32>
    %cst_35 = arith.constant 0.000000e+00 : f32
    %78 = vector.broadcast %cst_35 : f32 to vector<8x128xf32>
    %79 = arith.maximumf %77, %78 : vector<8x128xf32>
    %c4 = arith.constant 4 : index
    %c0_36 = arith.constant 0 : index
    %80 = vector.load %arg7[%c4, %c0_36] : memref<5x128xf32, #tpu.memory_space<vmem>>, vector<1x128xf32>
    %81 = vector.broadcast %80 : vector<1x128xf32> to vector<8x128xf32>
    %82 = arith.mulf %79, %81 : vector<8x128xf32>
    %cst_37 = arith.constant dense<0.000000e+00> : vector<8xf32>
    %83 = vector.multi_reduction <add>, %82, %cst_37 [1] : vector<8x128xf32> to vector<8xf32>
    %84 = vector.shape_cast %83 : vector<8xf32> to vector<8x1xf32>
    %c0_38 = arith.constant 0 : index
    %85 = memref.load %arg8[%c0_38] : memref<1xf32, #tpu.memory_space<smem>>
    %86 = vector.broadcast %85 : f32 to vector<8x1xf32>
    %87 = arith.addf %84, %86 : vector<8x1xf32>
    %88 = vector.shape_cast %87 : vector<8x1xf32> to vector<8x1xf32>
    %89 = vector.broadcast %88 : vector<8x1xf32> to vector<8x128xf32>
    %c0_39 = arith.constant 0 : index
    %c0_40 = arith.constant 0 : index
    %90 = vector.load %arg9[%c0_39, %c0_40] : memref<8x128xf32, #tpu.memory_space<vmem>>, vector<8x128xf32>
    tpu.vector_store %arg9[%c0_39, %c0_40], %89 {strides = array<i32>} : memref<8x128xf32, #tpu.memory_space<vmem>>, vector<8x128xf32>,
    return
  }
  func.func @transform_0(%arg0: i32) -> (i32, i32) {
    %c0_i32 = arith.constant 0 : i32
    %c0_i32_0 = arith.constant 0 : i32
    return %arg0, %c0_i32 : i32, i32
  }
  func.func @transform_1(%arg0: i32) -> (i32, i32) {
    %c0_i32 = arith.constant 0 : i32
    %c0_i32_0 = arith.constant 0 : i32
    return %arg0, %c0_i32 : i32, i32
  }
  func.func @transform_2(%arg0: i32) -> (i32, i32) {
    %c0_i32 = arith.constant 0 : i32
    %c0_i32_0 = arith.constant 0 : i32
    %c0_i32_1 = arith.constant 0 : i32
    return %c0_i32, %c0_i32_0 : i32, i32
  }
  func.func @transform_3(%arg0: i32) -> (i32, i32) {
    %c0_i32 = arith.constant 0 : i32
    %c0_i32_0 = arith.constant 0 : i32
    %c0_i32_1 = arith.constant 0 : i32
    return %c0_i32, %c0_i32_0 : i32, i32
  }
  func.func @transform_4(%arg0: i32) -> (i32, i32) {
    %c0_i32 = arith.constant 0 : i32
    %c0_i32_0 = arith.constant 0 : i32
    %c0_i32_1 = arith.constant 0 : i32
    return %c0_i32, %c0_i32_0 : i32, i32
  }
  func.func @transform_5(%arg0: i32) -> (i32, i32) {
    %c0_i32 = arith.constant 0 : i32
    %c0_i32_0 = arith.constant 0 : i32
    %c0_i32_1 = arith.constant 0 : i32
    return %c0_i32, %c0_i32_0 : i32, i32
  }
  func.func @transform_6(%arg0: i32) -> (i32, i32) {
    %c0_i32 = arith.constant 0 : i32
    %c0_i32_0 = arith.constant 0 : i32
    %c0_i32_1 = arith.constant 0 : i32
    return %c0_i32, %c0_i32_0 : i32, i32
  }
  func.func @transform_7(%arg0: i32) -> i32 {
    %c0_i32 = arith.constant 0 : i32
    %c0_i32_0 = arith.constant 0 : i32
    return %c0_i32 : i32
  }
  func.func @transform_8(%arg0: i32) -> (i32, i32) {
    %c0_i32 = arith.constant 0 : i32
    %c0_i32_0 = arith.constant 0 : i32
    return %arg0, %c0_i32 : i32, i32
  }
}

</mosaic_0001>

<bundles_post_ra>
// kernel: critic_forward.1
= control target key start
LH: loop header
LB: loop body
LE: loop exit
PB: predicated region body
PF: predicated region fallthrough
CT: control target
= control target key end

     0   :  { %v622_v0 = vmov 0.0|0.0   ;;  %vm623_vm0 = vmmov 0   ;;  %v624_v4 = vmov 0.0   ;;  %v127_v37 = vlaneseq  ;;  %s885_s2 = inlined_call_operand.vmem [shape: f32[128,128], index: 2, kind: input, shape index: {}]   ;;  %s886_s0 = inlined_call_operand.vmem [shape: f32[8,128], index: 0, kind: input, shape index: {}]   ;;  %s887_s5 = inlined_call_operand.vmem [shape: f32[3,128], index: 5, kind: input, shape index: {}]   ;;  %s888_s3 = inlined_call_operand.vmem [shape: f32[128,128], index: 3, kind: input, shape index: {}]   ;;  %s889_s4 = inlined_call_operand.vmem [shape: f32[128,128], index: 4, kind: input, shape index: {}]   ;;  %s890_s1 = inlined_call_operand.vmem [shape: f32[8,128], index: 1, kind: input, shape index: {}]   ;;  %s891_s6 = inlined_call_operand.vmem [shape: f32[5,128], index: 6, kind: input, shape index: {}]   ;;  %s892_s7 = inlined_call_operand.<no memory space> [shape: f32[1], index: 7, kind: input, shape index: {}]   ;;  %s893_s8 = inlined_call_operand.vmem [shape: f32[8,128], index: 8, kind: output, shape index: {}]  }
   0x1   :  { %543 = vmatprep.subr.bf16.mxu0 %v622_v0  ;;  %v31_v1 = vld [vmem:[%s885_s2] sm:$0xff]  ;;  %v32_v2 = vld [vmem:[%s885_s2 + $0x8] sm:$0xff]  ;;  %v33_v3 = vld [vmem:[%s885_s2 + $0x10] sm:$0xff]  ;;  %470 = vmatprep.mubr.msk.f32.mxu0 %vm623_vm0, %v624_v4 }
   0x2   :  { %v544_v5 = vpack.c.bf16 %v32_v2, %v31_v1  ;;  %v34_v6 = vld [vmem:[%s885_s2 + $0x18] sm:$0xff]  ;;  %567 = vmatprep.subr.bf16.mxu1 %v622_v0  ;;  %505 = vmatprep.mubr.msk.f32.mxu1 %vm623_vm0, %v624_v4  ;;  %v35_v8 = vld [vmem:[%s885_s2 + $0x20] sm:$0xff]  ;;  %v36_v9 = vld [vmem:[%s885_s2 + $0x28] sm:$0xff]  ;;  %v128_v38 = vand.u32 127, %v127_v37 }
   0x3   :  { %v547_v7 = vpack.c.bf16 %v34_v6, %v33_v3  ;;  %v550_v10 = vpack.c.bf16 %v36_v9, %v35_v8  ;;  %v37_v11 = vld [vmem:[%s885_s2 + $0x30] sm:$0xff]  ;;  %v38_v12 = vld [vmem:[%s885_s2 + $0x38] sm:$0xff]  ;;  %v39_v14 = vld [vmem:[%s885_s2 + $0x40] sm:$0xff] }
   0x4   :  { %545 = vmatpush3.bf16.msra.mxu0 %v544_v5  ;;  %v553_v13 = vpack.c.bf16 %v38_v12, %v37_v11  ;;  %v40_v15 = vld [vmem:[%s885_s2 + $0x48] sm:$0xff]  ;;  %v41_v17 = vld [vmem:[%s885_s2 + $0x50] sm:$0xff]  ;;  %v42_v18 = vld [vmem:[%s885_s2 + $0x58] sm:$0xff]  ;;  %vm129_vm1 = vcmp.lt.s32.totalorder %v128_v38, 32 }
   0x5   :  { %546 = vmatprep.subr.bf16.mxu0 %v622_v0  ;;  %v556_v16 = vpack.c.bf16 %v40_v15, %v39_v14  ;;  %v559_v19 = vpack.c.bf16 %v42_v18, %v41_v17  ;;  %v43_v20 = vld [vmem:[%s885_s2 + $0x60] sm:$0xff]  ;;  %v44_v21 = vld [vmem:[%s885_s2 + $0x68] sm:$0xff]  ;;  %v45_v23 = vld [vmem:[%s885_s2 + $0x70] sm:$0xff]  ;;  %v755_v41 = vsel %vm129_vm1, 1.0, %v624_v4 }
   0x6   :  { %v562_v22 = vpack.c.bf16 %v44_v21, %v43_v20  ;;  %v46_v24 = vld [vmem:[%s885_s2 + $0x78] sm:$0xff]  ;;  %v30_v26 = vld [vmem:[%s886_s0] sm:$0xff]  ;;  %v153_v32 = vld [vmem:[%s888_s3 + $0x8] sm:$0xff] }
   0x7   :  { %v565_v25 = vpack.c.bf16 %v46_v24, %v45_v23  ;;  %v378_v27 = vld [vmem:[%s887_s5] ss:$0 sm:$0xff]  ;;  %v154_v33 = vld [vmem:[%s888_s3 + $0x10] sm:$0xff]  ;;  %v155_v35 = vld [vmem:[%s888_s3 + $0x18] sm:$0xff] }
   0x8   :  { %548 = vmatpush3.bf16.msra.mxu0 %v547_v7  ;;  %v152_v31 = vld [vmem:[%s888_s3] sm:$0xff]  ;;  %v571_v36 = vpack.c.bf16 %v155_v35, %v154_v33  ;;  %v157_v46 = vld [vmem:[%s888_s3 + $0x28] sm:$0xff]  ;;  %v158_v48 = vld [vmem:[%s888_s3 + $0x30] sm:$0xff] }
   0x9   :  { %549 = vmatprep.subr.bf16.mxu0 %v622_v0  ;;  %v568_v34 = vpack.c.bf16 %v153_v32, %v152_v31  ;;  %v156_v45 = vld [vmem:[%s888_s3 + $0x20] sm:$0xff]  ;;  %v159_v49 = vld [vmem:[%s888_s3 + $0x38] sm:$0xff]  ;;  %v161_v52 = vld [vmem:[%s888_s3 + $0x48] sm:$0xff] }
   0xa   :  { %v574_v47 = vpack.c.bf16 %v157_v46, %v156_v45  ;;  %v577_v50 = vpack.c.bf16 %v159_v49, %v158_v48  ;;  %v160_v51 = vld [vmem:[%s888_s3 + $0x40] sm:$0xff]  ;;  %v162_v54 = vld [vmem:[%s888_s3 + $0x50] sm:$0xff]  ;;  %v163_v55 = vld [vmem:[%s888_s3 + $0x58] sm:$0xff] }
   0xb   :  { %569 = vmatpush3.bf16.msra.mxu1 %v568_v34  ;;  %v580_v53 = vpack.c.bf16 %v161_v52, %v160_v51  ;;  %v583_v56 = vpack.c.bf16 %v163_v55, %v162_v54  ;;  %v164_v57 = vld [vmem:[%s888_s3 + $0x60] sm:$0xff]  ;;  %v165_v58 = vld [vmem:[%s888_s3 + $0x68] sm:$0xff]  ;;  %v166_v60 = vld [vmem:[%s888_s3 + $0x70] sm:$0xff] }
   0xc   :  { %551 = vmatpush3.bf16.msra.mxu0 %v550_v10  ;;  %570 = vmatprep.subr.bf16.mxu1 %v622_v0  ;;  %v586_v59 = vpack.c.bf16 %v165_v58, %v164_v57  ;;  %v167_v61 = vld [vmem:[%s888_s3 + $0x78] sm:$0xff]  ;;  %v381_v6 = vld [vmem:[%s887_s5 + $0x2] ss:$0 sm:$0xff]  ;;  %v269_v11 = vld [vmem:[%s889_s4 + $0x8] sm:$0xff] }
   0xd   :  { %552 = vmatprep.subr.bf16.mxu0 %v622_v0  ;;  %v589_v62 = vpack.c.bf16 %v167_v61, %v166_v60  ;;  %v268_v10 = vld [vmem:[%s889_s4] sm:$0xff]  ;;  %v270_v12 = vld [vmem:[%s889_s4 + $0x10] sm:$0xff]  ;;  %v271_v14 = vld [vmem:[%s889_s4 + $0x18] sm:$0xff]  ;;  %v371_v61 = vstv %s892_s7 }
   0xe   :  { %v595_v15 = vpack.c.bf16 %v271_v14, %v270_v12  ;;  %v273_v17 = vld [vmem:[%s889_s4 + $0x28] sm:$0xff]  ;;  %v275_v20 = vld [vmem:[%s889_s4 + $0x38] sm:$0xff]  ;;  %v282_v31 = vld [vmem:[%s889_s4 + $0x70] sm:$0xff] }
   0xf   :  { %572 = vmatpush3.bf16.msra.mxu1 %v571_v36  ;;  %v277_v23 = vld [vmem:[%s889_s4 + $0x48] sm:$0xff]  ;;  %v283_v32 = vld [vmem:[%s889_s4 + $0x78] sm:$0xff]  ;;  %v267_v34 = vld [vmem:[%s890_s1] sm:$0xff] }
  0x10   :  { %554 = vmatpush3.bf16.msra.mxu0 %v553_v13  ;;  %573 = vmatprep.subr.bf16.mxu1 %v622_v0  ;;  %v592_v13 = vpack.c.bf16 %v269_v11, %v268_v10  ;;  %v613_v33 = vpack.c.bf16 %v283_v32, %v282_v31  ;;  %v382_v35 = vld [vmem:[%s891_s6] ss:$0 sm:$0xff]  ;;  %v385_v49 = vld [vmem:[%s891_s6 + $0x3] ss:$0 sm:$0xff]  ;;  %v383_v52 = vld [vmem:[%s891_s6 + $0x1] ss:$0 sm:$0xff] }
  0x11   :  { %555 = vmatprep.subr.bf16.mxu0 %v622_v0  ;;  %v386_v58 = vld [vmem:[%s891_s6 + $0x4] ss:$0 sm:$0xff] }
  0x13   :  { %575 = vmatpush3.bf16.msra.mxu1 %v574_v47 }
  0x14   :  { %557 = vmatpush3.bf16.msra.mxu0 %v556_v16  ;;  %576 = vmatprep.subr.bf16.mxu1 %v622_v0  ;;  %v272_v16 = vld [vmem:[%s889_s4 + $0x20] sm:$0xff] }
  0x15   :  { %558 = vmatprep.subr.bf16.mxu0 %v622_v0  ;;  %v598_v18 = vpack.c.bf16 %v273_v17, %v272_v16 }
  0x17   :  { %578 = vmatpush3.bf16.msra.mxu1 %v577_v50 }
  0x18   :  { %560 = vmatpush3.bf16.msra.mxu0 %v559_v19  ;;  %579 = vmatprep.subr.bf16.mxu1 %v622_v0  ;;  %v274_v19 = vld [vmem:[%s889_s4 + $0x30] sm:$0xff] }
  0x19   :  { %561 = vmatprep.subr.bf16.mxu0 %v622_v0  ;;  %v601_v21 = vpack.c.bf16 %v275_v20, %v274_v19 }
  0x1b   :  { %581 = vmatpush3.bf16.msra.mxu1 %v580_v53 }
  0x1c   :  { %563 = vmatpush3.bf16.msra.mxu0 %v562_v22  ;;  %582 = vmatprep.subr.bf16.mxu1 %v622_v0  ;;  %v276_v22 = vld [vmem:[%s889_s4 + $0x40] sm:$0xff] }
  0x1d   :  { %564 = vmatprep.subr.bf16.mxu0 %v622_v0  ;;  %v604_v24 = vpack.c.bf16 %v277_v23, %v276_v22 }
  0x1f   :  { %584 = vmatpush3.bf16.msra.mxu1 %v583_v56 }
  0x20   :  { %566 = vmatpush3.bf16.msra.mxu0 %v565_v25  ;;  %585 = vmatprep.subr.bf16.mxu1 %v622_v0  ;;  %v278_v25 = vld [vmem:[%s889_s4 + $0x50] sm:$0xff] }
  0x21   :  { %591 = vmatprep.subr.bf16.mxu0 %v622_v0 }
  0x23   :  { %471 = vmatmul.mubr.f32.vlgmr.msra.gmra.mrb[0].mxu0 %v30_v26  ;;  %587 = vmatpush3.bf16.msra.mxu1 %v586_v59  ;;  %v279_v26 = vld [vmem:[%s889_s4 + $0x58] sm:$0xff] }
  0x24   :  { %540 = vmatprep.mubr.msk.f32.mxu0 %vm623_vm0, %v624_v4  ;;  %588 = vmatprep.subr.bf16.mxu1 %v622_v0  ;;  %v380_v4 = vld [vmem:[%s887_s5 + $0x1] ss:$0 sm:$0xff] }
  0x25   :  { %593 = vmatpush3.bf16.msra.mxu0 %v592_v13 }
  0x26   :  { %594 = vmatprep.subr.bf16.mxu0 %v622_v0 }
  0x27   :  { %590 = vmatpush3.bf16.msra.mxu1 %v589_v62 }
  0x29   :  { %596 = vmatpush3.bf16.msra.mxu0 %v595_v15 }
  0x2a   :  { %597 = vmatprep.subr.bf16.mxu0 %v622_v0 }
  0x2d   :  { %599 = vmatpush3.bf16.msra.mxu0 %v598_v18 }
  0x2e   :  { %600 = vmatprep.subr.bf16.mxu0 %v622_v0 }
  0x31   :  { %602 = vmatpush3.bf16.msra.mxu0 %v601_v21 }
  0x32   :  { %603 = vmatprep.subr.bf16.mxu0 %v622_v0 }
  0x35   :  { %605 = vmatpush3.bf16.msra.mxu0 %v604_v24 }
  0x36   :  { %606 = vmatprep.subr.bf16.mxu0 %v622_v0 }
  0xf6   :  { %v118_v28 = vpop.f32.mrb[0].mxu0 }
  0xf7   :  { %v119_v29 = vadd.f32 %v378_v27, %v118_v28  ;;  %v472_v30 = vpop.f32.mrb[1].mxu0  ;;  %v607_v27 = vpack.c.bf16 %v279_v26, %v278_v25  ;;  %v280_v28 = vld [vmem:[%s889_s4 + $0x60] sm:$0xff] }
  0xf9   :  { %124 = vadd.xlane.f32.xlu0 %v119_v29  ;;  %608 = vmatpush3.bf16.msra.mxu0 %v607_v27 }
  0xfa   :  { %609 = vmatprep.subr.bf16.mxu0 %v622_v0 }
 0x186   :  { %v125_v39 = vpop.xlane.xlu0 %124 }
 0x187   :  { %v126_v40 = vmul.f32 0.03125, %v125_v39 }
 0x189   :  { %v132_v42 = vsub.f32 %v119_v29, %v126_v40  ;;  %v281_v29 = vld [vmem:[%s889_s4 + $0x68] sm:$0xff] }
 0x18a   :  { %v610_v30 = vpack.c.bf16 %v281_v29, %v280_v28 }
 0x18b   :  { %v133_v43 = vmul.f32 %v755_v41, %v132_v42 }
 0x18c   :  { %611 = vmatpush3.bf16.msra.mxu0 %v610_v30 }
 0x18d   :  { %v134_v44 = vmul.f32 %v133_v43, %v133_v43  ;;  %612 = vmatprep.subr.bf16.mxu0 %v622_v0 }
 0x18f   :  { %135 = vadd.xlane.f32.xlu0 %v134_v44 }
 0x190   :  { %614 = vmatpush3.bf16.msra.mxu0 %v613_v33 }
 0x193   :  { %541 = vmatmul.mubr.f32.vlgmr.msra.gmra.mrb[2].mxu0 %v267_v34 }
 0x21c   :  { %v136_v63 = vpop.xlane.xlu0 %135 }
 0x21d   :  { %v137_v1 = vmul.f32 0.03125, %v136_v63 }
 0x21f   :  { %v138_v2 = vadd.f32 1e-05, %v137_v1 }
 0x221   :  { %618 = vrsqrt.f32 %v138_v2 }
 0x22b   :  { %v619_v3 = vpop.eup %618 }
 0x22c   :  { %v140_v5 = vmul.f32 %v619_v3, %v133_v43 }
 0x22e   :  { %v145_v7 = vmul.f32 %v380_v4, %v140_v5 }
 0x230   :  { %v150_v8 = vadd.f32 %v381_v6, %v145_v7 }
 0x232   :  { %v151_v9 = vmax.f32 %v150_v8, 0.0 }
 0x234   :  { %506 = vmatmul.mubr.f32.vlgmr.msra.gmra.mrb[0].mxu1 %v151_v9 }
 0x266   :  { %v355_v44 = vpop.f32.mrb[2].mxu0 }
 0x267   :  { %v542_v45 = vpop.f32.mrb[3].mxu0  ;;  %v356_v50 = vadd.f32 %v385_v49, %v355_v44 }
 0x269   :  { %v359_v55 = vmax.f32 %v356_v50, 0.0 }
 0x307   :  { %v239_v36 = vpop.f32.mrb[0].mxu1 }
 0x308   :  { %v240_v37 = vadd.f32 %v382_v35, %v239_v36  ;;  %v507_v38 = vpop.f32.mrb[1].mxu1 }
 0x30a   :  { %245 = vadd.xlane.f32.xlu1 %v240_v37 }
 0x397   :  { %v246_v39 = vpop.xlane.xlu1 %245 }
 0x398   :  { %v247_v40 = vmul.f32 0.03125, %v246_v39 }
 0x39a   :  { %v248_v42 = vsub.f32 %v240_v37, %v247_v40 }
 0x39c   :  { %v249_v43 = vmul.f32 %v755_v41, %v248_v42  ;;  %v384_v41 = vld [vmem:[%s891_s6 + $0x2] ss:$0 sm:$0xff] }
 0x39e   :  { %v250_v0 = vmul.f32 %v249_v43, %v249_v43 }
 0x3a0   :  { %251 = vadd.xlane.f32.xlu1 %v250_v0 }
 0x42d   :  { %v252_v46 = vpop.xlane.xlu1 %251 }
 0x42e   :  { %v253_v47 = vmul.f32 0.03125, %v252_v46 }
 0x430   :  { %v254_v48 = vadd.f32 1e-05, %v253_v47 }
 0x432   :  { %620 = vrsqrt.f32 %v254_v48 }
 0x43c   :  { %v621_v51 = vpop.eup %620 }
 0x43d   :  { %v256_v53 = vmul.f32 %v621_v51, %v249_v43 }
 0x43f   :  { %v261_v54 = vmul.f32 %v383_v52, %v256_v53 }
 0x441   :  { %v266_v56 = vadd.f32 %v384_v41, %v261_v54 }
 0x443   :  { %v360_v57 = vadd.f32 %v359_v55, %v266_v56 }
 0x445   :  { %v361_v59 = vmax.f32 %v360_v57, 0.0 }
 0x447   :  { %v367_v60 = vmul.f32 %v386_v58, %v361_v59 }
 0x449   :  { %368 = vadd.xlane.f32.xlu0 %v367_v60 }
 0x4d6   :  { %v369_v62 = vpop.xlane.xlu0 %368 }
 0x4d7   :  { %v372_v63 = vadd.f32 %v371_v61, %v369_v62 }
 0x4d9   :  { %373 = vst [vmem:[%s893_s8] sm:$0xff] %v372_v63 }

</bundles_post_ra>
